<compile_context>
chip_gen: v6e
topology: v6e:2x2x1
jax: 0.10.0
libtpu: 0.0.40
codegen_flags: <defaults>
</compile_context>

<pallas_src>
import functools

import jax
import jax.numpy as jnp
from jax import lax
from jax.experimental import pallas as pl
from jax.experimental.pallas import tpu as pltpu


def _round_up(a, b):
    return (a + b - 1) // b * b


# ----------------------------- Pallas kernels ------------------------------

def _conv_stats_kernel(p_ref, w_ref, y_ref, stats_ref):
    """One M-tile: bf16 matmul (f32 acc) + per-tile channel sum / sum-of-squares."""
    y = jnp.dot(p_ref[...], w_ref[...], preferred_element_type=jnp.float32)
    y_ref[...] = y

    s = jnp.sum(y, axis=0, keepdims=True)         # (1, Cp) f32
    ss = jnp.sum(y * y, axis=0, keepdims=True)    # (1, Cp) f32
    # Pack [sum; sumsq; zeros] into an (8, Cp) slab (tile-aligned output).
    row = lax.broadcasted_iota(jnp.int32, (8, y.shape[1]), 0)
    stats = jnp.where(row == 0, s, jnp.where(row == 1, ss, 0.0))
    stats_ref[...] = stats[None]                  # (1, 8, Cp)


def _conv_bias_kernel(p_ref, w_ref, b_ref, y_ref):
    """bn_act=False path: one M-tile of conv-as-matmul + bias."""
    y = jnp.dot(p_ref[...], w_ref[...], preferred_element_type=jnp.float32)
    y_ref[...] = (y + b_ref[...]).astype(y_ref.dtype)


def _scale_shift_leaky_kernel(y_ref, scale_ref, shift_ref, out_ref, *, negative_slope):
    """Pass 2: y*scale + shift (folded BN affine), then LeakyReLU."""
    y = y_ref[...] * scale_ref[...] + shift_ref[...]
    out_ref[...] = jnp.where(y > 0, y, negative_slope * y).astype(out_ref.dtype)


# ------------------------------- JAX glue ----------------------------------

def _im2col(x, kh, kw, stride, padding):
    """x: (N, C, H, W) -> patches (N*OH*OW, C*KH*KW), plus (OH, OW)."""
    n, c, h, w = x.shape
    xp = jnp.pad(x, ((0, 0), (0, 0), (padding, padding), (padding, padding)))
    oh = (h + 2 * padding - kh) // stride + 1
    ow = (w + 2 * padding - kw) // stride + 1
    cols = []
    for i in range(kh):
        for j in range(kw):
            cols.append(xp[:, :, i:i + stride * oh:stride, j:j + stride * ow:stride])
    patches = jnp.stack(cols, axis=2)                       # (N, C, KH*KW, OH, OW)
    patches = patches.transpose(0, 3, 4, 1, 2).reshape(n * oh * ow, c * kh * kw)
    return patches, oh, ow


def _pick_tile_m(m, kp, cp):
    """Largest M tile that keeps double-buffered blocks within a safe VMEM budget."""
    budget = 20 * 1024 * 1024                     # conservative: fits v5e/v6e/v7x
    try:
        budget = min(budget, int(pltpu.get_tpu_info().vmem_capacity_bytes) // 3)
    except Exception:
        pass
    resident = 2 * kp * cp * 2 + (1 << 20)        # double-buffered bf16 weight + slack
    per_row = 2 * (kp * 2 + cp * 4 + 64)          # 2x (bf16 patches row + f32 out row)
    tile = max(128, min(2048, (budget - resident) // per_row))
    tile = (tile // 128) * 128
    tile = min(tile, _round_up(m, 8))
    return max(8, (tile // 8) * 8)


def cnn_block_forward(x, conv_weight, conv_bias, bn_gamma, bn_beta, *,
                      stride=1, padding=1, bn_act=True,
                      eps=1e-5, negative_slope=0.1, tile_m=None):
    """CNNBlock forward. x: (N, Cin, H, W) NCHW. Returns (N, Cout, OH, OW) f32."""
    n, cin, h, w = x.shape
    cout, _, kh, kw = conv_weight.shape

    # im2col in bf16 (halves HBM traffic of the largest operand).
    patches, oh, ow = _im2col(x.astype(jnp.bfloat16), kh, kw, stride, padding)
    m, k = patches.shape

    kp = _round_up(k, 16)       # bf16 sublane multiple for the (K, Cout) weight
    cp = _round_up(cout, 128)   # lane-dense output (no masked partial stores)
    tm = int(tile_m) if tile_m is not None else _pick_tile_m(m, kp, cp)
    mp = _round_up(m, tm)
    nt = mp // tm

    # Zero padding: padded K columns contribute nothing to the matmul; padded M
    # rows / Cout channels produce exact zeros and are sliced off at the end.
    patches_p = jnp.pad(patches, ((0, mp - m), (0, kp - k)))
    wmat = conv_weight.reshape(cout, k).T.astype(jnp.bfloat16)
    wmat_p = jnp.pad(wmat, ((0, kp - k), (0, cp - cout)))

    cparams = pltpu.CompilerParams(
        dimension_semantics=("parallel",),          # M tiles are independent
        vmem_limit_bytes=32 * 1024 * 1024)

    p_spec = pl.BlockSpec((tm, kp), lambda i: (i, 0))
    w_spec = pl.BlockSpec((kp, cp), lambda i: (0, 0))     # resident weight
    vec_spec = pl.BlockSpec((1, cp), lambda i: (0, 0))    # grid-invariant per-channel
    y_spec = pl.BlockSpec((tm, cp), lambda i: (i, 0))

    matmul_cost = pl.CostEstimate(
        flops=2 * mp * kp * cp, transcendentals=0,
        bytes_accessed=mp * kp * 2 + kp * cp * 2 + mp * cp * 4)

    if bn_act:
        # Pass 1: tiled conv matmul + per-tile channel statistics.
        y_p, stats = pl.pallas_call(
            _conv_stats_kernel,
            out_shape=(jax.ShapeDtypeStruct((mp, cp), jnp.float32),
                       jax.ShapeDtypeStruct((nt, 8, cp), jnp.float32)),
            grid=(nt,),
            in_specs=[p_spec, w_spec],
            out_specs=(y_spec, pl.BlockSpec((1, 8, cp), lambda i: (i, 0, 0))),
            compiler_params=cparams,
            cost_estimate=matmul_cost,
        )(patches_p, wmat_p)

        # Merge the tiny per-tile partial stats (f32 sums; zero-padded rows are
        # exact zeros so dividing by the real M is correct).
        ch_sum = jnp.sum(stats[:, 0, :], axis=0)
        ch_sumsq = jnp.sum(stats[:, 1, :], axis=0)
        mean = ch_sum / m
        var = jnp.maximum(ch_sumsq / m - mean * mean, 0.0)  # biased var, f32 accum
        gamma_p = jnp.pad(bn_gamma.astype(jnp.float32), (0, cp - cout))
        beta_p = jnp.pad(bn_beta.astype(jnp.float32), (0, cp - cout))
        scale = (gamma_p * lax.rsqrt(var + eps)).reshape(1, cp)
        shift = (beta_p - mean * scale[0]).reshape(1, cp)

        # Pass 2: mem-bound fused BN-affine + LeakyReLU, tiled over M.
        out_p = pl.pallas_call(
            functools.partial(_scale_shift_leaky_kernel,
                              negative_slope=negative_slope),
            out_shape=jax.ShapeDtypeStruct((mp, cp), jnp.float32),
            grid=(nt,),
            in_specs=[y_spec, vec_spec, vec_spec],
            out_specs=y_spec,
            compiler_params=cparams,
        )(y_p, scale, shift)
    else:
        bias_p = jnp.pad(conv_bias.astype(jnp.float32), (0, cp - cout)).reshape(1, cp)
        out_p = pl.pallas_call(
            _conv_bias_kernel,
            out_shape=jax.ShapeDtypeStruct((mp, cp), jnp.float32),
            grid=(nt,),
            in_specs=[p_spec, w_spec, vec_spec],
            out_specs=y_spec,
            compiler_params=cparams,
            cost_estimate=matmul_cost,
        )(patches_p, wmat_p, bias_p)

    # (Mp, Cp) -> (N, OH, OW, Cout). NHWC is the lane-dense layout a following
    # conv would prefer; transpose to NCHW only to match the PyTorch module.
    out = out_p[:m, :cout].reshape(n, oh, ow, cout)
    return out.transpose(0, 3, 1, 2)


# ------------------------------ reference ----------------------------------

def _reference(x, conv_weight, conv_bias, bn_gamma, bn_beta, *,
               stride=1, padding=1, bn_act=True, eps=1e-5, negative_slope=0.1):
    # Mirror the kernel's bf16 matmul inputs (f32 accumulation) so tolerances
    # stay tight; bf16*bf16 products are exact in f32.
    xq = x.astype(jnp.bfloat16).astype(jnp.float32)
    wq = conv_weight.astype(jnp.bfloat16).astype(jnp.float32)
    y = lax.conv_general_dilated(
        xq, wq, window_strides=(stride, stride),
        padding=[(padding, padding), (padding, padding)],
        dimension_numbers=("NCHW", "OIHW", "NCHW"),
        preferred_element_type=jnp.float32)
    if not bn_act:
        return y + conv_bias.reshape(1, -1, 1, 1).astype(jnp.float32)
    mean = jnp.mean(y, axis=(0, 2, 3), keepdims=True)
    var = jnp.mean((y - mean) ** 2, axis=(0, 2, 3), keepdims=True)
    y = (y - mean) * lax.rsqrt(var + eps)
    y = y * bn_gamma.reshape(1, -1, 1, 1) + bn_beta.reshape(1, -1, 1, 1)
    return jnp.where(y > 0, y, negative_slope * y)


# --------------------------------- main -------------------------------------

if __name__ == "__main__":
    key = jax.random.PRNGKey(0)
    k_x, k_w, k_b, k_g, k_be = jax.random.split(key, 5)

    N, Cin, H, W = 2, 4, 16, 16
    Cout, KH, KW = 8, 3, 3

    x = jax.random.normal(k_x, (N, Cin, H, W), dtype=jnp.float32)
    conv_weight = jax.random.normal(k_w, (Cout, Cin, KH, KW), dtype=jnp.float32) * 0.1
    conv_bias = jax.random.normal(k_b, (Cout,), dtype=jnp.float32) * 0.1
    # PyTorch BatchNorm2d default init is gamma=1, beta=0; perturb deterministically.
    bn_gamma = 1.0 + 0.1 * jax.random.normal(k_g, (Cout,), dtype=jnp.float32)
    bn_beta = 0.1 * jax.random.normal(k_be, (Cout,), dtype=jnp.float32)

    # 1) bn_act=True, stride 1. tile_m=128 forces 4 M-tiles (M=512) so the
    #    pipelined multi-tile path and the cross-tile BN stat merge are exercised.
    out = cnn_block_forward(x, conv_weight, conv_bias, bn_gamma, bn_beta,
                            stride=1, padding=1, bn_act=True, tile_m=128)
    out = jax.block_until_ready(out)
    ref = _reference(x, conv_weight, conv_bias, bn_gamma, bn_beta,
                     stride=1, padding=1, bn_act=True)
    assert out.shape == (N, Cout, H, W)
    assert jnp.allclose(out, ref, atol=2e-3, rtol=2e-3), \
        float(jnp.max(jnp.abs(out - ref)))

    # 2) bn_act=True, stride 2 (YOLO downsample block), auto tile size.
    out_s2 = cnn_block_forward(x, conv_weight, conv_bias, bn_gamma, bn_beta,
                               stride=2, padding=1, bn_act=True)
    out_s2 = jax.block_until_ready(out_s2)
    ref_s2 = _reference(x, conv_weight, conv_bias, bn_gamma, bn_beta,
                        stride=2, padding=1, bn_act=True)
    assert out_s2.shape == (N, Cout, H // 2, W // 2)
    assert jnp.allclose(out_s2, ref_s2, atol=2e-3, rtol=2e-3), \
        float(jnp.max(jnp.abs(out_s2 - ref_s2)))

    # 3) bn_act=False (plain conv + bias).
    out_nb = cnn_block_forward(x, conv_weight, conv_bias, bn_gamma, bn_beta,
                               stride=1, padding=1, bn_act=False, tile_m=128)
    out_nb = jax.block_until_ready(out_nb)
    ref_nb = _reference(x, conv_weight, conv_bias, bn_gamma, bn_beta,
                        stride=1, padding=1, bn_act=False)
    assert jnp.allclose(out_nb, ref_nb, atol=2e-3, rtol=2e-3), \
        float(jnp.max(jnp.abs(out_nb - ref_nb)))

    print("KERNEL_OK")
</pallas_src>

<mosaic_0001>
module attributes {stable_mosaic.version = 11 : i64} {
  func.func @_conv_stats_kernel(%arg0: i32, %arg1: memref<128x48xbf16, #tpu.memory_space<vmem>>, %arg2: memref<48x128xbf16, #tpu.memory_space<vmem>>, %arg3: memref<128x128xf32, #tpu.memory_space<vmem>>, %arg4: memref<1x8x128xf32, #tpu.memory_space<vmem>>) attributes {dimension_semantics = [#tpu.dimension_semantics<parallel>], iteration_bounds = array<i64: 4>, scalar_prefetch = 0 : i64, scratch_operands = 0 : i64, tpu.core_type = #tpu.core_type<tc>, window_params = [{transform_indices = @transform_0, window_bounds = array<i64: 128, 48>}, {pipeline_mode = #tpu.pipeline_mode<synchronous>, transform_indices = @transform_1, window_bounds = array<i64: 48, 128>}, {transform_indices = @transform_2, window_bounds = array<i64: 128, 128>}, {transform_indices = @transform_3, window_bounds = array<i64: 1, 8, 128>}]} {
    %c0 = arith.constant 0 : index
    %c0_0 = arith.constant 0 : index
    %0 = vector.load %arg1[%c0, %c0_0] : memref<128x48xbf16, #tpu.memory_space<vmem>>, vector<128x48xbf16>
    %c0_1 = arith.constant 0 : index
    %c0_2 = arith.constant 0 : index
    %1 = vector.load %arg2[%c0_1, %c0_2] : memref<48x128xbf16, #tpu.memory_space<vmem>>, vector<48x128xbf16>
    %cst = arith.constant dense<0.000000e+00> : vector<128x128xf32>
    %2 = tpu.matmul %0, %1, %cst {dimension_numbers = #tpu.dot_dimension_numbers<[1], [0], [0], [1], [0, 0, 1, 1], [], []>} : vector<128x48xbf16>, vector<48x128xbf16>, vector<128x128xf32> -> vector<128x128xf32>
    %c0_3 = arith.constant 0 : index
    %c0_4 = arith.constant 0 : index
    %3 = vector.load %arg3[%c0_3, %c0_4] : memref<128x128xf32, #tpu.memory_space<vmem>>, vector<128x128xf32>
    tpu.vector_store %arg3[%c0_3, %c0_4], %2 {strides = array<i32>} : memref<128x128xf32, #tpu.memory_space<vmem>>, vector<128x128xf32>,
    %cst_5 = arith.constant dense<0.000000e+00> : vector<128xf32>
    %4 = vector.multi_reduction <add>, %2, %cst_5 [0] : vector<128x128xf32> to vector<128xf32>
    %5 = vector.shape_cast %4 : vector<128xf32> to vector<1x128xf32>
    %6 = arith.mulf %2, %2 : vector<128x128xf32>
    %cst_6 = arith.constant dense<0.000000e+00> : vector<128xf32>
    %7 = vector.multi_reduction <add>, %6, %cst_6 [0] : vector<128x128xf32> to vector<128xf32>
    %8 = vector.shape_cast %7 : vector<128xf32> to vector<1x128xf32>
    %9 = tpu.iota {dimensions = array<i32: 0>} : vector<8x128xi32>
    %c0_i32 = arith.constant 0 : i32
    %10 = vector.broadcast %c0_i32 : i32 to vector<8x128xi32>
    %11 = arith.cmpi eq, %9, %10 : vector<8x128xi32>
    %c1_i32 = arith.constant 1 : i32
    %12 = vector.broadcast %c1_i32 : i32 to vector<8x128xi32>
    %13 = arith.cmpi eq, %9, %12 : vector<8x128xi32>
    %cst_7 = arith.constant 0.000000e+00 : f32
    %14 = vector.shape_cast %8 : vector<1x128xf32> to vector<1x128xf32>
    %15 = vector.broadcast %14 : vector<1x128xf32> to vector<8x128xf32>
    %16 = vector.broadcast %cst_7 : f32 to vector<8x128xf32>
    %17 = arith.select %13, %15, %16 : vector<8x128xi1>, vector<8x128xf32>
    %18 = vector.shape_cast %5 : vector<1x128xf32> to vector<1x128xf32>
    %19 = vector.broadcast %18 : vector<1x128xf32> to vector<8x128xf32>
    %20 = arith.select %11, %19, %17 : vector<8x128xi1>, vector<8x128xf32>
    %21 = vector.shape_cast %20 : vector<8x128xf32> to vector<1x8x128xf32>
    %c0_8 = arith.constant 0 : index
    %c0_9 = arith.constant 0 : index
    %c0_10 = arith.constant 0 : index
    %22 = vector.load %arg4[%c0_8, %c0_9, %c0_10] : memref<1x8x128xf32, #tpu.memory_space<vmem>>, vector<1x8x128xf32>
    tpu.vector_store %arg4[%c0_8, %c0_9, %c0_10], %21 {strides = array<i32>} : memref<1x8x128xf32, #tpu.memory_space<vmem>>, vector<1x8x128xf32>,
    return
  }
  func.func @transform_0(%arg0: i32) -> (i32, i32) {
    %c0_i32 = arith.constant 0 : i32
    %c0_i32_0 = arith.constant 0 : i32
    return %arg0, %c0_i32 : i32, i32
  }
  func.func @transform_1(%arg0: i32) -> (i32, i32) {
    %c0_i32 = arith.constant 0 : i32
    %c0_i32_0 = arith.constant 0 : i32
    %c0_i32_1 = arith.constant 0 : i32
    return %c0_i32, %c0_i32_0 : i32, i32
  }
  func.func @transform_2(%arg0: i32) -> (i32, i32) {
    %c0_i32 = arith.constant 0 : i32
    %c0_i32_0 = arith.constant 0 : i32
    return %arg0, %c0_i32 : i32, i32
  }
  func.func @transform_3(%arg0: i32) -> (i32, i32, i32) {
    %c0_i32 = arith.constant 0 : i32
    %c0_i32_0 = arith.constant 0 : i32
    %c0_i32_1 = arith.constant 0 : i32
    return %arg0, %c0_i32, %c0_i32_0 : i32, i32, i32
  }
}

</mosaic_0001>

<bundles_post_ra>
// kernel: tpu_custom_call.1
= control target key start
LH: loop header
LB: loop body
LE: loop exit
PB: predicated region body
PF: predicated region fallthrough
CT: control target
= control target key end

     0   :  { %9 = vsyncpa [#allocation3], 0  ;;  %s1046_s0 = inlined_call_operand.vmem [shape: bf16[512,48], index: 0, kind: input, shape index: {}]   ;;  %s1047_s1 = inlined_call_operand.vmem [shape: bf16[48,128], index: 1, kind: input, shape index: {}]   ;;  %s1048_s2 = inlined_call_operand.hbm [shape: f32[512,128], index: 2, kind: output, shape index: {0}]   ;;  %s1049_s3 = inlined_call_operand.hbm [shape: f32[4,8,128], index: 3, kind: output, shape index: {1}]  }
   0x1   :  { %11 = vsyncpa [#allocation3 + $0x1], 0 }
   0x2   :  { %12 = vsyncpa [#allocation5], 0 }
   0x3   :  { %14 = vsyncpa [#allocation5 + $0x1], 0  ;;  %s840_s12 = smov 0   ;;  %s842_s13 = smov 0  }
   0x4   :  { %s844_s14 = smov 0   ;;  %s846_s15 = smov 0  }
   0x5 LB: > { %s861_s16 = sadd.s32 4294967295, %s814_s15   ;;  %s593_s17 = sadd.s32 4294967294, %s814_s15   ;;  %s814_s15 = sphi %s846_s15, %s1055_s15   ;;  %s810_s14 = sphi %s844_s14, %s1054_s14   ;;  %s806_s13 = sphi %s842_s13, %s1053_s13   ;;  %s802_s12 = sphi %s840_s12, %s1052_s12  }
   0x6   : > { %s865_s18 = sadd.s32 1, %s814_s15   ;;  %s74_s19 = sadd.s32 1, %s810_s14 }
   0x7   : > { %s71_s20 = ssub.s32 %s814_s15, %s865_s18  ;;  %p84_p0 = scmp.ne.s32.totalorder %s810_s14, %s806_s13 }
   0x8   : > { %p72_p1 = scmp.eq.s32.totalorder %s71_s20, 0  ;;  %p85_p2 = scmp.eq.s32.totalorder %s861_s16, 3 }
   0x9   : > { %p90_p3 = scmp.ne.s32.totalorder %s806_s13, %s802_s12  ;;  %p91_p4 = scmp.eq.s32.totalorder %s593_s17, 3 }
   0xa   : > { %s876_s21 = scalar_select %p72_p1, %s810_s14, %s74_s19  }
   0xb   : > { %p878_p5 = por %p85_p2, %p84_p0  ;;  %p882_p6 = por %p91_p4, %p90_p3 }
   0xc   : > { %p596_p7 = scmp.ge.s32.totalorder %s814_s15, 1  ;;  %p147_p8 = scmp.lt.s32.totalorder %s814_s15, 5 }
   0xe   : > { %p148_p9 = pnand %p596_p7, %p147_p8 }
   0xf   : > { %s599_s26 = sshll.u32 (!%p148_p9), %s861_s16, 4  ;;  %s910_s8 = sand.u32 (!%p148_p9), 1, %s806_s13  }
  0x10   : > { %151 = sbr.rel (%p148_p9) target bundleno = 302 (0x12e), region = 28  ;;  %p177_p10 = scmp.lt.s32.totalorder (!%p148_p9), %s599_s26, 63 }
  0x11   : > { %s597_s9 = sshll.u32 (!%p148_p9), %s910_s8, 7  ;;  %s627_s11 = sshll.u32 (!%p148_p9), %s861_s16, 11 }
  0x12   : > { %s915_s10 = scalar_lea.vmem (!%p148_p9), [#allocation2], %s597_s9  ;;  %s952_s24 = scalar_lea.hbm (!%p148_p9), %s1048_s2, %s627_s11 }
  0x13   : > { %s486_s17 = sshll.u32 (!%p148_p9), %s915_s10, 4  ;;  %s468_s25 = scalar_lea.sflag (!%p148_p9), [#allocation3], %s910_s8  ;;  %s954_s17 = int_to_ptr.vmem [resolvable:$true] %s486_s17 }
  0x14   : > { %s816_s27 = smov (!%p148_p9), [#allocation2]  }
  0x15   : > { %v713_v0 = vld [vmem:[%s1047_s1 + $0x10] sm:$0xff]   ;;  %v714_v1 = vld [vmem:[%s1047_s1 + $0x8] sm:$0xff]   ;;  %s1057_s26 = smov (!%p177_p10, %s599_s26), 63  ;;  %v715_v2 = vld [vmem:[%s1047_s1] sm:$0xff]   ;;  %vm264_vm0 = vcmask 392192   ;;  %s728_s28 = sshll.u32 %s816_s27, 4  ;;  %s729_s28 = int_to_ptr.vmem [resolvable:$false] %s728_s28 }
  0x16   : > { %639 = vmatprep.subr.bf16.mxu0 %v713_v0  ;;  %661 = vmatprep.subr.bf16.mxu1 %v713_v0  ;;  %s600_s4 = sshll.u32 %s1057_s26, 2  ;;  %s724_s26 = scalar_lea.vmem %s954_s17, 2048 }
  0x17   : > { %640 = vmatpush3.bf16.msra.mxu0 %v713_v0  ;;  %664 = vmatpush3.bf16.msra.mxu1 %v713_v0  ;;  %s180_s7 = scalar_lea.vmem %s1046_s0, %s600_s4  ;;  %p725_p11 = scmp.ne.s32.totalorder %s954_s17, %s724_s26 }
  0x18   : > { %641 = vmatprep.subr.bf16.mxu0 %v714_v1  ;;  %662 = vmatprep.subr.bf16.mxu1 %v714_v1  ;;  %v716_v3 = vld [vmem:[%s180_s7] sm:$0xff]   ;;  %v717_v4 = vld [vmem:[%s180_s7 + $0x8] sm:$0xff]   ;;  %v718_v5 = vld [vmem:[%s180_s7 + $0x10] sm:$0xff]   ;;  %s730_s29 = scalar_lea.vmem %s729_s28, 4096  ;;  %p731_p0 = scmp.lt.s32.totalorder %s954_s17, %s729_s28 }
  0x19   : > { %645 = vmatprep.mubr.msk.bf16.mxu0 %vm264_vm0, %v716_v3  ;;  %v720_v6 = vld [vmem:[%s180_s7 + $0x20] sm:$0xff]   ;;  %v721_v7 = vld [vmem:[%s180_s7 + $0x28] sm:$0xff]   ;;  %v722_v8 = vld [vmem:[%s180_s7 + $0x30] sm:$0xff]   ;;  %p726_p12 = pnand %p725_p11, %p878_p5  ;;  %p732_p1 = scmp.lt.s32.totalorder %s730_s29, %s724_s26 }
  0x1a   : > { %653 = vmatprep.mubr.msk.bf16.mxu1 %vm264_vm0, %v720_v6  ;;  %v719_v9 = vld [vmem:[%s180_s7 + $0x18] sm:$0xff]  }
  0x1b   : > { %642 = vmatpush3.bf16.msra.mxu0 %v714_v1  ;;  %665 = vmatpush3.bf16.msra.mxu1 %v714_v1  ;;  %v723_v10 = vld [vmem:[%s180_s7 + $0x38] sm:$0xff]   ;;  %p727_p13 = pneg %p726_p12  ;;  %p733_p2 = por %p732_p1, %p731_p0 }
  0x1c   : > { %643 = vmatprep.subr.bf16.mxu0 %v715_v2  ;;  %663 = vmatprep.subr.bf16.mxu1 %v715_v2 }
  0x1d   : > { %p734_p3 = pnand %p733_p2, %p727_p13 }
  0x1f   : > { %644 = vmatpush3.bf16.msra.mxu0 %v715_v2  ;;  %666 = vmatpush3.bf16.msra.mxu1 %v715_v2 }
  0x22   : > { %646 = vmatmul.mubr.msk.bf16.vlgmr.msra.gmra.mxu0 %vm264_vm0, %v717_v4  ;;  %654 = vmatmul.mubr.msk.bf16.vlgmr.msra.gmra.mxu1 %vm264_vm0, %v721_v7 }
  0x23   : > { %649 = vmatprep.mubr.msk.bf16.mxu0 %vm264_vm0, %v718_v5  ;;  %657 = vmatprep.mubr.msk.bf16.mxu1 %vm264_vm0, %v722_v8 }
  0x2a   : > { %650 = vmatmul.mubr.msk.bf16.gmra.mxu0 %vm264_vm0, %v719_v9  ;;  %658 = vmatmul.mubr.msk.bf16.gmra.mxu1 %vm264_vm0, %v723_v10 }
  0xe2   : > { %v647_v11 = vpop.f32.mrf.mxu0  ;;  %v913_v12 = vpop.f32.mrf.mxu1 }
  0xe3   : > { %388 = vst [vmem:[%s915_s10 + $0x10] sm:$0xff] %v647_v11  ;;  %396 = vst [vmem:[%s915_s10 + $0x50] sm:$0xff] %v913_v12  ;;  %v425_v24 = vmul.f32 %v647_v11, %v647_v11 }
  0xe4   : > { %v323_v13 = vpop.f32.mrf.mxu0  ;;  %v920_v14 = vpop.f32.mrf.mxu1 }
  0xe5   : > { %386 = vst [vmem:[%s915_s10] sm:$0xff] %v323_v13  ;;  %394 = vst [vmem:[%s915_s10 + $0x40] sm:$0xff] %v920_v14  ;;  %v423_v19 = vmul.f32 %v323_v13, %v323_v13 }
  0xe6   : > { %v648_v15 = vpop.f32.mrf.mxu0  ;;  %v925_v16 = vpop.f32.mrf.mxu1 }
  0xe7   : > { %389 = vst [vmem:[%s915_s10 + $0x18] sm:$0xff] %v648_v15  ;;  %397 = vst [vmem:[%s915_s10 + $0x58] sm:$0xff] %v925_v16  ;;  %v426_v29 = vmul.f32 %v648_v15, %v648_v15 }
  0xe8   : > { %v326_v17 = vpop.f32.mrf.mxu0  ;;  %v930_v18 = vpop.f32.mrf.mxu1 }
  0xe9   : > { %387 = vst [vmem:[%s915_s10 + $0x8] sm:$0xff] %v326_v17  ;;  %v402_v20 = vadd.f32 %v326_v17, %v323_v13  ;;  %v424_v21 = vmul.f32 %v326_v17, %v326_v17  ;;  %395 = vst [vmem:[%s915_s10 + $0x48] sm:$0xff] %v930_v18 }
  0xea   : > { %v651_v22 = vpop.f32.mrf.mxu0  ;;  %v935_v23 = vpop.f32.mrf.mxu1 }
  0xeb   : > { %v403_v25 = vadd.f32 %v647_v11, %v402_v20  ;;  %v439_v26 = vadd.f32 %v424_v21, %v423_v19  ;;  %392 = vst [vmem:[%s915_s10 + $0x30] sm:$0xff] %v651_v22  ;;  %400 = vst [vmem:[%s915_s10 + $0x70] sm:$0xff] %v935_v23 }
  0xec   : > { %v339_v27 = vpop.f32.mrf.mxu0  ;;  %v942_v28 = vpop.f32.mrf.mxu1 }
  0xed   : > { %v440_v30 = vadd.f32 %v439_v26, %v425_v24  ;;  %390 = vst [vmem:[%s915_s10 + $0x20] sm:$0xff] %v339_v27  ;;  %v404_v31 = vadd.f32 %v648_v15, %v403_v25  ;;  %398 = vst [vmem:[%s915_s10 + $0x60] sm:$0xff] %v942_v28  ;;  %v427_v35 = vmul.f32 %v339_v27, %v339_v27 }
  0xee   : > { %v652_v32 = vpop.f32.mrf.mxu0  ;;  %v947_v33 = vpop.f32.mrf.mxu1 }
  0xef   : > { %v405_v34 = vadd.f32 %v404_v31, %v339_v27  ;;  %v441_v36 = vadd.f32 %v440_v30, %v426_v29  ;;  %393 = vst [vmem:[%s915_s10 + $0x38] sm:$0xff] %v652_v32  ;;  %401 = vst [vmem:[%s915_s10 + $0x78] sm:$0xff] %v947_v33 }
  0xf0   : > { %v342_v37 = vpop.f32.mrf.mxu0  ;;  %v374_v38 = vpop.f32.mrf.mxu1 }
  0xf1   : > { %v442_v39 = vadd.f32 %v441_v36, %v427_v35  ;;  %391 = vst [vmem:[%s915_s10 + $0x28] sm:$0xff] %v342_v37  ;;  %v406_v40 = vadd.f32 %v405_v34, %v342_v37  ;;  %v428_v41 = vmul.f32 %v342_v37, %v342_v37  ;;  %399 = vst [vmem:[%s915_s10 + $0x68] sm:$0xff] %v374_v38 }
  0xf2   : > { %737 = shalt.err (!%p734_p3)
}
  0xf3   : > { %s738_s30 = scalar_lea.hbm %s952_s24, 2048  ;;  %s742_s6 = scalar_lea.hbm %s1048_s2, 8192 }
  0xf4   : > { %p739_p4 = scmp.ne.s32.totalorder %s952_s24, %s738_s30  ;;  %p743_p9 = scmp.lt.s32.totalorder %s952_s24, %s1048_s2 }
  0xf5   : > { %p744_p10 = scmp.lt.s32.totalorder %s742_s6, %s738_s30 }
  0xf6   : > { %p740_p7 = pnand %p739_p4, %p878_p5 }
  0xf7   : > { %p745_p11 = por %p744_p10, %p743_p9 }
  0xf8   : > { %p741_p8 = pneg %p740_p7 }
  0xfa   : > { %p746_p12 = pnand %p745_p11, %p741_p8 }
  0xfc   : > { %749 = shalt.err (!%p746_p12)
}
  0xfd   : > { %s817_s10 = smov 128   ;;  %s818_s11 = smov 8   ;;  %v429_v42 = vmul.f32 %v651_v22, %v651_v22  ;;  %v407_v43 = vadd.f32 %v651_v22, %v406_v40  ;;  %v443_v44 = vadd.f32 %v442_v39, %v428_v41  ;;  %v430_v45 = vmul.f32 %v652_v32, %v652_v32 }
  0xfe   : > { %667 = dma.vmem_to_hbm [thread:$0]  (%p878_p5), %s954_s17, 2048, %s952_s24, %s468_s25, %s817_s10, %s817_s10, %s818_s11   ;;  %v431_v48 = vmul.f32 %v920_v14, %v920_v14  ;;  %v432_v52 = vmul.f32 %v930_v18, %v930_v18  ;;  %v433_v54 = vmul.f32 %v913_v12, %v913_v12  ;;  %v434_v57 = vmul.f32 %v925_v16, %v925_v16 }
  0xff   : > { %v408_v46 = vadd.f32 %v652_v32, %v407_v43  ;;  %v444_v47 = vadd.f32 %v443_v44, %v429_v42  ;;  %v435_v61 = vmul.f32 %v942_v28, %v942_v28  ;;  %v436_v1 = vmul.f32 %v374_v38, %v374_v38  ;;  %s598_s17 = sshll.u32 %s910_s8, 3  ;;  %s624_s19 = sshll.u32 %s861_s16, 7 }
 0x100   : > { %v437_v2 = vmul.f32 %v935_v23, %v935_v23  ;;  %v438_v5 = vmul.f32 %v947_v33, %v947_v33  ;;  %s175_s20 = scalar_lea.vmem [#allocation4], %s598_s17  ;;  %s1010_s27 = scalar_lea.hbm %s1049_s3, %s624_s19 }
 0x101   : > { %v445_v49 = vadd.f32 %v444_v47, %v430_v45  ;;  %v409_v50 = vadd.f32 %v408_v46, %v920_v14  ;;  %s502_s24 = sshll.u32 %s175_s20, 4  ;;  %s473_s28 = scalar_lea.sflag [#allocation5], %s910_s8  ;;  %s503_s24 = int_to_ptr.vmem [resolvable:$true] %s502_s24 }
 0x102   : > { %s750_s29 = scalar_lea.vmem %s503_s24, 128  ;;  %s819_s16 = smov [#allocation4]  }
 0x103   : > { %v410_v51 = vadd.f32 %v409_v50, %v930_v18  ;;  %v446_v53 = vadd.f32 %v445_v49, %v431_v48  ;;  %p751_p13 = scmp.ne.s32.totalorder %s503_s24, %s750_s29  ;;  %s754_s30 = sshll.u32 %s819_s16, 4  ;;  %s755_s30 = int_to_ptr.vmem [resolvable:$false] %s754_s30 }
 0x104   : > { %s756_s4 = scalar_lea.vmem %s755_s30, 256  ;;  %p757_p2 = scmp.lt.s32.totalorder %s503_s24, %s755_s30 }
 0x105   : > { %v411_v55 = vadd.f32 %v913_v12, %v410_v51  ;;  %v447_v56 = vadd.f32 %v446_v53, %v432_v52  ;;  %v460_v12 = vlaneseq  ;;  %p752_p0 = pnand %p751_p13, %p878_p5  ;;  %p758_p3 = scmp.lt.s32.totalorder %s756_s4, %s750_s29 }
 0x107   : > { %v448_v58 = vadd.f32 %v447_v56, %v433_v54  ;;  %v412_v59 = vadd.f32 %v925_v16, %v411_v55  ;;  %v461_v17 = vshrl.u32 %v460_v12, 7  ;;  %p753_p1 = pneg %p752_p0  ;;  %p759_p4 = por %p758_p3, %p757_p2 }
 0x109   : > { %v413_v60 = vadd.f32 %v412_v59, %v942_v28  ;;  %v449_v62 = vadd.f32 %v448_v58, %v434_v57  ;;  %vm463_vm1 = vcmp.eq.s32.totalorder %v461_v17, 1  ;;  %vm462_vm2 = vcmp.eq.s32.totalorder %v461_v17, 0  ;;  %p760_p7 = pnand %p759_p4, %p753_p1 }
 0x10b   : > { %v450_v63 = vadd.f32 %v449_v62, %v435_v61  ;;  %v414_v0 = vadd.f32 %v413_v60, %v374_v38 }
 0x10d   : > { %v415_v3 = vadd.f32 %v935_v23, %v414_v0  ;;  %v451_v4 = vadd.f32 %v450_v63, %v436_v1 }
 0x10f   : > { %v416_v6 = vadd.f32 %v947_v33, %v415_v3  ;;  %v452_v7 = vadd.f32 %v451_v4, %v437_v2 }
 0x111   : > { %v417_v8 = vrot.slane %v416_v6, 4  ;;  %v453_v9 = vadd.f32 %v452_v7, %v438_v5 }
 0x113   : > { %v418_v10 = vadd.f32 %v417_v8, %v416_v6  ;;  %v454_v11 = vrot.slane %v453_v9, 4 }
 0x115   : > { %v419_v13 = vrot.slane %v418_v10, 2  ;;  %v455_v14 = vadd.f32 %v454_v11, %v453_v9 }
 0x117   : > { %v420_v15 = vadd.f32 %v419_v13, %v418_v10  ;;  %v456_v16 = vrot.slane %v455_v14, 2 }
 0x119   : > { %v457_v18 = vadd.f32 %v456_v16, %v455_v14  ;;  %v421_v19 = vrot.slane %v420_v15, 1 }
 0x11b   : > { %v458_v20 = vrot.slane %v457_v18, 1  ;;  %v422_v22 = vadd.f32 %v421_v19, %v420_v15 }
 0x11d   : > { %v459_v21 = vadd.f32 %v458_v20, %v457_v18 }
 0x11f   : > { %v464_v23 = vsel %vm463_vm1, %v459_v21, 0.0 }
 0x120   : > { %v465_v24 = vsel %vm462_vm2, %v422_v22, %v464_v23 }
 0x121   : > { %466 = vst [vmem:[%s175_s20] sm:$0xff] %v465_v24 }
 0x122   : > { %763 = shalt.err (!%p760_p7)
}
 0x123   : > { %s764_s5 = scalar_lea.hbm %s1010_s27, 128  ;;  %s768_s7 = scalar_lea.hbm %s1049_s3, 512 }
 0x124   : > { %p765_p8 = scmp.ne.s32.totalorder %s1010_s27, %s764_s5  ;;  %p769_p11 = scmp.lt.s32.totalorder %s1010_s27, %s1049_s3 }
 0x125   : > { %p770_p12 = scmp.lt.s32.totalorder %s768_s7, %s764_s5 }
 0x126   : > { %p766_p9 = pnand %p765_p8, %p878_p5 }
 0x127   : > { %p771_p13 = por %p770_p12, %p769_p11 }
 0x128   : > { %p767_p10 = pneg %p766_p9 }
 0x12a   : > { %p772_p0 = pnand %p771_p13, %p767_p10 }
 0x12c   : > { %775 = shalt.err (!%p772_p0)
}
 0x12d   : > { %668 = dma.vmem_to_hbm [thread:$0]  (%p878_p5), %s503_s24, 128, %s1010_s27, %s473_s28  }
 0x12e PF: > { %p678_p1 = scmp.ge.s32.totalorder %s814_s15, 2  ;;  %s514_s11 = sand.u32 1, %s802_s12  }
 0x12f   : > { %s515_s17 = scalar_lea.sflag [#allocation3], %s514_s11 }
 0x130   : > { %p672_p2 = pnand %p678_p1, %p882_p6 }
 0x132   : > { %p673_p3 = pneg %p672_p2 }
 0x134   : > { %793 = dma.done.wait (%p673_p3), %s515_s17, 2048  }
 0x135   : > { %795 = vsyncadd (%p673_p3), %s515_s17, 4294965248  ;;  %s524_s19 = scalar_lea.sflag [#allocation5], %s514_s11 }
 0x136   : > { %797 = dma.done.wait (%p673_p3), %s524_s19, 128  }
 0x137   : > { %799 = vsyncadd (%p673_p3), %s524_s19, 4294967168  ;;  %p17_p5 = scmp.ge.s32.totalorder %s865_s18, 6   ;;  %s1052_s12 = smov %s806_s13 }
 0x138   : > { %s1053_s13 = smov %s810_s14  ;;  %s1054_s14 = smov %s876_s21 }
 0x139   : > { %s1055_s15 = smov %s865_s18  ;;  %19 = sbr.rel (!%p17_p5) target bundleno = 5 (0x5), region = 80 }
 0x13e   :  { %529 = vsyncpa [#allocation3], 1 }
 0x13f   :  { %531 = vsyncpa [#allocation3 + $0x1], 1 }
 0x140   :  { %532 = vsyncpa [#allocation5], 1 }
 0x141   :  { %534 = vsyncpa [#allocation5 + $0x1], 1 }

</bundles_post_ra>
